<compile_context>
chip_gen: v7x
topology: tpu7x:2x2x1
jax: 0.10.0
libtpu: 0.0.40
codegen_flags: <defaults>
</compile_context>

<pallas_src>
import functools

import jax
import jax.numpy as jnp
from jax import lax
from jax.experimental import pallas as pl
from jax.experimental.pallas import tpu as pltpu

_LANE = 128
_SUB = 8  # sublane packing factor


def _sisnr_moments_kernel(enh_ref, cln_ref,
                          se_ref, sc_ref, sec_ref, scc_ref, see_ref,
                          *, rows, n_chunks, nb, bps, pad_cols, t_tile, unroll):
    s = pl.program_id(0)           # shard axis ("parallel")
    i = pl.program_id(1)           # column-block axis ("arbitrary")
    blk = s * bps + i              # logical column-block index (may overrun nb)

    @pl.when(i == 0)
    def _init():
        zeros = jnp.zeros((rows, _LANE), jnp.float32)
        se_ref[...] = zeros
        sc_ref[...] = zeros
        sec_ref[...] = zeros
        scc_ref[...] = zeros
        see_ref[...] = zeros

    @pl.when(blk < nb)             # skip the clamped duplicate steps of the last shard
    def _accumulate():
        # Ragged tail: the last logical block extends past the real column
        # count.  Zero the (static-width) garbage suffix of the VMEM buffers
        # once, so the hot loop needs no per-element masking and zero-padding
        # stays exact for the sums.
        if pad_cols > 0:
            @pl.when(blk == nb - 1)
            def _zero_tail():
                enh_ref[:, t_tile - pad_cols:] = jnp.zeros(
                    (rows, pad_cols), enh_ref.dtype)
                cln_ref[:, t_tile - pad_cols:] = jnp.zeros(
                    (rows, pad_cols), cln_ref.dtype)

        def body(j, carry):
            p_se, p_sc, p_sec, p_scc, p_see = carry
            col = pl.multiple_of(j * _LANE, _LANE)
            e = enh_ref[:, pl.ds(col, _LANE)].astype(jnp.float32)
            c = cln_ref[:, pl.ds(col, _LANE)].astype(jnp.float32)
            return (p_se + e, p_sc + c, p_sec + e * c,
                    p_scc + c * c, p_see + e * e)

        init = tuple(jnp.zeros((rows, _LANE), jnp.float32) for _ in range(5))
        p_se, p_sc, p_sec, p_scc, p_see = lax.fori_loop(
            0, n_chunks, body, init, unroll=unroll)

        se_ref[...] += p_se
        sc_ref[...] += p_sc
        sec_ref[...] += p_sec
        scc_ref[...] += p_scc
        see_ref[...] += p_see


def sisnr_loss(enhanced_signal, clean_signal, *, max_tile_cols=None):
    """Negative SI-SNR loss.  Inputs: [batch, time] (possibly different time)."""
    # Match PyTorch: truncate both signals to the common length.
    t = min(enhanced_signal.shape[-1], clean_signal.shape[-1])
    enh = enhanced_signal[:, :t]
    cln = clean_signal[:, :t]
    b = enh.shape[0]

    # Sublane packing: [B, T] -> [B*8, T/8] is a free reshape when T % 8 == 0.
    # Odd lengths fall back to the unpacked layout (still no extra HBM copy).
    sub = _SUB if t % _SUB == 0 else 1
    rows = b * sub
    cols = t // sub
    enh = enh.reshape(rows, cols)
    cln = cln.reshape(rows, cols)

    # --- generation-aware time-tile sizing --------------------------------
    try:
        vmem_cap = int(pltpu.get_tpu_info().vmem_capacity_bytes)
    except Exception:                      # off-device / older runtimes
        vmem_cap = 64 * 1024 * 1024        # v7x-safe assumption
    # Budget for the pipelined input slabs: 2 inputs x 2 pipeline buffers.
    io_budget = min(vmem_cap // 3, 32 * 1024 * 1024)
    bytes_per_col = 2 * rows * (enh.dtype.itemsize + cln.dtype.itemsize)
    t_tile = max(_LANE, (io_budget // bytes_per_col) // _LANE * _LANE)
    cols128 = pl.cdiv(cols, _LANE) * _LANE
    t_tile = min(t_tile, cols128)
    if max_tile_cols is not None:          # test hook: force small tiles
        t_tile = max(_LANE, min(t_tile, max_tile_cols // _LANE * _LANE))

    nb = pl.cdiv(cols, t_tile)             # number of column blocks
    pad_cols = nb * t_tile - cols          # garbage columns in the last block
    nshard = 2 if nb >= 2 else 1           # v7x: one shard per TensorCore
    bps = pl.cdiv(nb, nshard)              # blocks per shard
    n_chunks = t_tile // _LANE

    if nshard * bps == nb:                 # exact split: no clamping needed
        def in_map(s, i):
            return (0, s * bps + i)
    else:                                  # clamp so skipped steps never DMA OOB
        def in_map(s, i):
            return (0, jnp.minimum(s * bps + i, nb - 1))

    kernel = functools.partial(
        _sisnr_moments_kernel, rows=rows, n_chunks=n_chunks, nb=nb, bps=bps,
        pad_cols=pad_cols, t_tile=t_tile, unroll=min(8, n_chunks))

    acc_spec = pl.BlockSpec((None, rows, _LANE), lambda s, i: (s, 0, 0))
    acc_shape = jax.ShapeDtypeStruct((nshard, rows, _LANE), jnp.float32)

    # TODO(synk): if a trace shows exposed DMA, add pipeline_mode=pl.Buffered(3)
    # on the input specs (watch v7x's 64 MiB VMEM).
    moments = pl.pallas_call(
        kernel,
        out_shape=(acc_shape,) * 5,
        grid_spec=pltpu.PrefetchScalarGridSpec(
            num_scalar_prefetch=0,
            grid=(nshard, bps),
            in_specs=[
                pl.BlockSpec((rows, t_tile), in_map),
                pl.BlockSpec((rows, t_tile), in_map),
            ],
            out_specs=(acc_spec,) * 5,
        ),
        compiler_params=pltpu.CompilerParams(
            dimension_semantics=("parallel", "arbitrary"),
            vmem_limit_bytes=int(io_budget + 16 * 1024 * 1024),
        ),
    )(enh, cln)

    # --- tiny finalize in plain JAX (a few KB of data) ---------------------
    def fold(x):  # (nshard, rows, 128) -> (batch,)
        return x.sum(axis=(0, 2)).reshape(b, sub).sum(axis=-1)

    se, sc, sec, scc, see = (fold(m) for m in moments)
    inv_t = jnp.float32(1.0 / t)
    dot = sec - se * sc * inv_t            # sum(e_centered * c_centered)
    te = scc - sc * sc * inv_t             # sum(c_centered ** 2)
    ee = see - se * se * inv_t             # sum(e_centered ** 2)
    alpha = dot / (te + 1e-8)
    s_target_energy = alpha * alpha * te
    e_noise_energy = ee - 2.0 * alpha * dot + alpha * alpha * te
    e_noise_energy = jnp.maximum(e_noise_energy, 0.0)   # guard rounding < 0
    si_snr = 10.0 * jnp.log10(s_target_energy / (e_noise_energy + 1e-8))
    return -jnp.mean(si_snr)


def _sisnr_ref(enhanced_signal, clean_signal):
    """Pure-JAX reference mirroring the PyTorch module, for verification."""
    min_length = min(enhanced_signal.shape[-1], clean_signal.shape[-1])
    e = enhanced_signal[:, :min_length].astype(jnp.float32)
    c = clean_signal[:, :min_length].astype(jnp.float32)
    e = e - jnp.mean(e, axis=-1, keepdims=True)
    c = c - jnp.mean(c, axis=-1, keepdims=True)
    dot = jnp.sum(e * c, axis=-1, keepdims=True)
    te = jnp.sum(c ** 2, axis=-1, keepdims=True)
    s_t = dot / (te + 1e-8) * c
    e_n = e - s_t
    si = 10.0 * jnp.log10(jnp.sum(s_t ** 2, axis=-1) /
                          (jnp.sum(e_n ** 2, axis=-1) + 1e-8))
    return -jnp.mean(si)


if __name__ == "__main__":
    key = jax.random.PRNGKey(0)
    k1, k2, k3, k4 = jax.random.split(key, 4)

    # Case 1: different lengths, odd common length -> min-length truncation,
    # unpacked fallback layout, single partial block (ragged tail zeroing).
    enhanced = jax.random.normal(k1, (2, 160), dtype=jnp.float32)
    clean = jax.random.normal(k2, (2, 131), dtype=jnp.float32)
    loss1 = jax.block_until_ready(sisnr_loss(enhanced, clean))
    ref1 = jax.block_until_ready(_sisnr_ref(enhanced, clean))
    assert jnp.allclose(loss1, ref1, rtol=1e-4, atol=1e-4), (loss1, ref1)

    # Case 2: longer signal, length % 8 == 0 -> sublane-packed layout.
    clean2 = jax.random.normal(k3, (2, 5000), dtype=jnp.float32)
    enhanced2 = clean2 + 0.3 * jax.random.normal(k4, (2, 5000), dtype=jnp.float32)
    loss2 = jax.block_until_ready(sisnr_loss(enhanced2, clean2))
    ref2 = jax.block_until_ready(_sisnr_ref(enhanced2, clean2))
    assert jnp.allclose(loss2, ref2, rtol=1e-4, atol=1e-4), (loss2, ref2)

    # Case 3: force small tiles -> multi-block streaming grid, two "parallel"
    # shards, clamped+skipped trailing block, ragged-tail zeroing.
    loss3 = jax.block_until_ready(sisnr_loss(enhanced2, clean2, max_tile_cols=256))
    assert jnp.allclose(loss3, ref2, rtol=1e-4, atol=1e-4), (loss3, ref2)

    print("KERNEL_OK")
</pallas_src>

<mosaic_0001>
module attributes {stable_mosaic.version = 11 : i64} {
  func.func @_sisnr_moments_kernel(%arg0: i32, %arg1: i32, %arg2: memref<2x256xf32, #tpu.memory_space<vmem>>, %arg3: memref<2x256xf32, #tpu.memory_space<vmem>>, %arg4: memref<1x2x128xf32, #tpu.memory_space<vmem>>, %arg5: memref<1x2x128xf32, #tpu.memory_space<vmem>>, %arg6: memref<1x2x128xf32, #tpu.memory_space<vmem>>, %arg7: memref<1x2x128xf32, #tpu.memory_space<vmem>>, %arg8: memref<1x2x128xf32, #tpu.memory_space<vmem>>) attributes {dimension_semantics = [#tpu.dimension_semantics<parallel>, #tpu.dimension_semantics<arbitrary>], iteration_bounds = array<i64: 1, 1>, scalar_prefetch = 0 : i64, scratch_operands = 0 : i64, tpu.core_type = #tpu.core_type<tc>, window_params = [{transform_indices = @transform_0, window_bounds = array<i64: 2, 256>}, {transform_indices = @transform_1, window_bounds = array<i64: 2, 256>}, {transform_indices = @transform_2, window_bounds = array<i64: 1, 2, 128>}, {transform_indices = @transform_3, window_bounds = array<i64: 1, 2, 128>}, {transform_indices = @transform_4, window_bounds = array<i64: 1, 2, 128>}, {transform_indices = @transform_5, window_bounds = array<i64: 1, 2, 128>}, {transform_indices = @transform_6, window_bounds = array<i64: 1, 2, 128>}]} {
    %c1_i32 = arith.constant 1 : i32
    %0 = arith.muli %arg0, %c1_i32 : i32
    %1 = arith.addi %0, %arg1 : i32
    %c0_i32 = arith.constant 0 : i32
    %2 = arith.cmpi eq, %arg1, %c0_i32 : i32
    %3 = arith.extui %2 : i1 to i32
    %c0_i32_0 = arith.constant 0 : i32
    %4 = arith.cmpi ne, %3, %c0_i32_0 : i32
    scf.if %4 {
      %cst = arith.constant 0.000000e+00 : f32
      %8 = vector.broadcast %cst : f32 to vector<2x128xf32>
      %c0 = arith.constant 0 : index
      %c0_3 = arith.constant 0 : index
      %c0_4 = arith.constant 0 : index
      %9 = vector.load %arg4[%c0, %c0_3, %c0_4] : memref<1x2x128xf32, #tpu.memory_space<vmem>>, vector<1x2x128xf32>
      %10 = vector.shape_cast %9 : vector<1x2x128xf32> to vector<2x128xf32>
      %11 = vector.shape_cast %8 : vector<2x128xf32> to vector<1x2x128xf32>
      tpu.vector_store %arg4[%c0, %c0_3, %c0_4], %11 {strides = array<i32>} : memref<1x2x128xf32, #tpu.memory_space<vmem>>, vector<1x2x128xf32>,
      %c0_5 = arith.constant 0 : index
      %c0_6 = arith.constant 0 : index
      %c0_7 = arith.constant 0 : index
      %12 = vector.load %arg5[%c0_5, %c0_6, %c0_7] : memref<1x2x128xf32, #tpu.memory_space<vmem>>, vector<1x2x128xf32>
      %13 = vector.shape_cast %12 : vector<1x2x128xf32> to vector<2x128xf32>
      %14 = vector.shape_cast %8 : vector<2x128xf32> to vector<1x2x128xf32>
      tpu.vector_store %arg5[%c0_5, %c0_6, %c0_7], %14 {strides = array<i32>} : memref<1x2x128xf32, #tpu.memory_space<vmem>>, vector<1x2x128xf32>,
      %c0_8 = arith.constant 0 : index
      %c0_9 = arith.constant 0 : index
      %c0_10 = arith.constant 0 : index
      %15 = vector.load %arg6[%c0_8, %c0_9, %c0_10] : memref<1x2x128xf32, #tpu.memory_space<vmem>>, vector<1x2x128xf32>
      %16 = vector.shape_cast %15 : vector<1x2x128xf32> to vector<2x128xf32>
      %17 = vector.shape_cast %8 : vector<2x128xf32> to vector<1x2x128xf32>
      tpu.vector_store %arg6[%c0_8, %c0_9, %c0_10], %17 {strides = array<i32>} : memref<1x2x128xf32, #tpu.memory_space<vmem>>, vector<1x2x128xf32>,
      %c0_11 = arith.constant 0 : index
      %c0_12 = arith.constant 0 : index
      %c0_13 = arith.constant 0 : index
      %18 = vector.load %arg7[%c0_11, %c0_12, %c0_13] : memref<1x2x128xf32, #tpu.memory_space<vmem>>, vector<1x2x128xf32>
      %19 = vector.shape_cast %18 : vector<1x2x128xf32> to vector<2x128xf32>
      %20 = vector.shape_cast %8 : vector<2x128xf32> to vector<1x2x128xf32>
      tpu.vector_store %arg7[%c0_11, %c0_12, %c0_13], %20 {strides = array<i32>} : memref<1x2x128xf32, #tpu.memory_space<vmem>>, vector<1x2x128xf32>,
      %c0_14 = arith.constant 0 : index
      %c0_15 = arith.constant 0 : index
      %c0_16 = arith.constant 0 : index
      %21 = vector.load %arg8[%c0_14, %c0_15, %c0_16] : memref<1x2x128xf32, #tpu.memory_space<vmem>>, vector<1x2x128xf32>
      %22 = vector.shape_cast %21 : vector<1x2x128xf32> to vector<2x128xf32>
      %23 = vector.shape_cast %8 : vector<2x128xf32> to vector<1x2x128xf32>
      tpu.vector_store %arg8[%c0_14, %c0_15, %c0_16], %23 {strides = array<i32>} : memref<1x2x128xf32, #tpu.memory_space<vmem>>, vector<1x2x128xf32>,
    } else {
    }
    %c1_i32_1 = arith.constant 1 : i32
    %5 = arith.cmpi slt, %1, %c1_i32_1 : i32
    %6 = arith.extui %5 : i1 to i32
    %c0_i32_2 = arith.constant 0 : i32
    %7 = arith.cmpi ne, %6, %c0_i32_2 : i32
    scf.if %7 {
      %c0_i32_3 = arith.constant 0 : i32
      %8 = arith.cmpi eq, %1, %c0_i32_3 : i32
      %9 = arith.extui %8 : i1 to i32
      %c0_i32_4 = arith.constant 0 : i32
      %10 = arith.cmpi ne, %9, %c0_i32_4 : i32
      scf.if %10 {
        %cst_45 = arith.constant 0.000000e+00 : f32
        %74 = vector.broadcast %cst_45 : f32 to vector<2x125xf32>
        %c0_46 = arith.constant 0 : index
        %c131 = arith.constant 131 : index
        %75 = vector.load %arg2[%c0_46, %c131] : memref<2x256xf32, #tpu.memory_space<vmem>>, vector<2x125xf32>
        tpu.vector_store %arg2[%c0_46, %c131], %74 {strides = array<i32>} : memref<2x256xf32, #tpu.memory_space<vmem>>, vector<2x125xf32>,
        %cst_47 = arith.constant 0.000000e+00 : f32
        %76 = vector.broadcast %cst_47 : f32 to vector<2x125xf32>
        %c0_48 = arith.constant 0 : index
        %c131_49 = arith.constant 131 : index
        %77 = vector.load %arg3[%c0_48, %c131_49] : memref<2x256xf32, #tpu.memory_space<vmem>>, vector<2x125xf32>
        tpu.vector_store %arg3[%c0_48, %c131_49], %76 {strides = array<i32>} : memref<2x256xf32, #tpu.memory_space<vmem>>, vector<2x125xf32>,
      } else {
      }
      %cst = arith.constant 0.000000e+00 : f32
      %11 = vector.broadcast %cst : f32 to vector<2x128xf32>
      %cst_5 = arith.constant 0.000000e+00 : f32
      %12 = vector.broadcast %cst_5 : f32 to vector<2x128xf32>
      %cst_6 = arith.constant 0.000000e+00 : f32
      %13 = vector.broadcast %cst_6 : f32 to vector<2x128xf32>
      %cst_7 = arith.constant 0.000000e+00 : f32
      %14 = vector.broadcast %cst_7 : f32 to vector<2x128xf32>
      %cst_8 = arith.constant 0.000000e+00 : f32
      %15 = vector.broadcast %cst_8 : f32 to vector<2x128xf32>
      %c0_i32_9 = arith.constant 0 : i32
      %c128_i32 = arith.constant 128 : i32
      %16 = arith.muli %c0_i32_9, %c128_i32 : i32
      %17 = tpu.assume_multiple %16, 128 : i32
      %c0 = arith.constant 0 : index
      %18 = arith.index_cast %17 : i32 to index
      %19 = vector.load %arg2[%c0, %18] : memref<2x256xf32, #tpu.memory_space<vmem>>, vector<2x128xf32>
      %c0_10 = arith.constant 0 : index
      %20 = arith.index_cast %17 : i32 to index
      %21 = vector.load %arg3[%c0_10, %20] : memref<2x256xf32, #tpu.memory_space<vmem>>, vector<2x128xf32>
      %22 = arith.addf %11, %19 : vector<2x128xf32>
      %23 = arith.addf %12, %21 : vector<2x128xf32>
      %24 = arith.mulf %19, %21 : vector<2x128xf32>
      %25 = arith.addf %13, %24 : vector<2x128xf32>
      %26 = arith.mulf %21, %21 : vector<2x128xf32>
      %27 = arith.addf %14, %26 : vector<2x128xf32>
      %28 = arith.mulf %19, %19 : vector<2x128xf32>
      %29 = arith.addf %15, %28 : vector<2x128xf32>
      %c1_i32_11 = arith.constant 1 : i32
      %c128_i32_12 = arith.constant 128 : i32
      %30 = arith.muli %c1_i32_11, %c128_i32_12 : i32
      %31 = tpu.assume_multiple %30, 128 : i32
      %c0_13 = arith.constant 0 : index
      %32 = arith.index_cast %31 : i32 to index
      %33 = vector.load %arg2[%c0_13, %32] : memref<2x256xf32, #tpu.memory_space<vmem>>, vector<2x128xf32>
      %c0_14 = arith.constant 0 : index
      %34 = arith.index_cast %31 : i32 to index
      %35 = vector.load %arg3[%c0_14, %34] : memref<2x256xf32, #tpu.memory_space<vmem>>, vector<2x128xf32>
      %36 = arith.addf %22, %33 : vector<2x128xf32>
      %37 = arith.addf %23, %35 : vector<2x128xf32>
      %38 = arith.mulf %33, %35 : vector<2x128xf32>
      %39 = arith.addf %25, %38 : vector<2x128xf32>
      %40 = arith.mulf %35, %35 : vector<2x128xf32>
      %41 = arith.addf %27, %40 : vector<2x128xf32>
      %42 = arith.mulf %33, %33 : vector<2x128xf32>
      %43 = arith.addf %29, %42 : vector<2x128xf32>
      %c2_i32 = arith.constant 2 : i32
      %c0_15 = arith.constant 0 : index
      %c0_16 = arith.constant 0 : index
      %c0_17 = arith.constant 0 : index
      %44 = vector.load %arg4[%c0_15, %c0_16, %c0_17] : memref<1x2x128xf32, #tpu.memory_space<vmem>>, vector<1x2x128xf32>
      %45 = vector.shape_cast %44 : vector<1x2x128xf32> to vector<2x128xf32>
      %46 = arith.addf %45, %36 : vector<2x128xf32>
      %c0_18 = arith.constant 0 : index
      %c0_19 = arith.constant 0 : index
      %c0_20 = arith.constant 0 : index
      %47 = vector.load %arg4[%c0_18, %c0_19, %c0_20] : memref<1x2x128xf32, #tpu.memory_space<vmem>>, vector<1x2x128xf32>
      %48 = vector.shape_cast %47 : vector<1x2x128xf32> to vector<2x128xf32>
      %49 = vector.shape_cast %46 : vector<2x128xf32> to vector<1x2x128xf32>
      tpu.vector_store %arg4[%c0_18, %c0_19, %c0_20], %49 {strides = array<i32>} : memref<1x2x128xf32, #tpu.memory_space<vmem>>, vector<1x2x128xf32>,
      %c0_21 = arith.constant 0 : index
      %c0_22 = arith.constant 0 : index
      %c0_23 = arith.constant 0 : index
      %50 = vector.load %arg5[%c0_21, %c0_22, %c0_23] : memref<1x2x128xf32, #tpu.memory_space<vmem>>, vector<1x2x128xf32>
      %51 = vector.shape_cast %50 : vector<1x2x128xf32> to vector<2x128xf32>
      %52 = arith.addf %51, %37 : vector<2x128xf32>
      %c0_24 = arith.constant 0 : index
      %c0_25 = arith.constant 0 : index
      %c0_26 = arith.constant 0 : index
      %53 = vector.load %arg5[%c0_24, %c0_25, %c0_26] : memref<1x2x128xf32, #tpu.memory_space<vmem>>, vector<1x2x128xf32>
      %54 = vector.shape_cast %53 : vector<1x2x128xf32> to vector<2x128xf32>
      %55 = vector.shape_cast %52 : vector<2x128xf32> to vector<1x2x128xf32>
      tpu.vector_store %arg5[%c0_24, %c0_25, %c0_26], %55 {strides = array<i32>} : memref<1x2x128xf32, #tpu.memory_space<vmem>>, vector<1x2x128xf32>,
      %c0_27 = arith.constant 0 : index
      %c0_28 = arith.constant 0 : index
      %c0_29 = arith.constant 0 : index
      %56 = vector.load %arg6[%c0_27, %c0_28, %c0_29] : memref<1x2x128xf32, #tpu.memory_space<vmem>>, vector<1x2x128xf32>
      %57 = vector.shape_cast %56 : vector<1x2x128xf32> to vector<2x128xf32>
      %58 = arith.addf %57, %39 : vector<2x128xf32>
      %c0_30 = arith.constant 0 : index
      %c0_31 = arith.constant 0 : index
      %c0_32 = arith.constant 0 : index
      %59 = vector.load %arg6[%c0_30, %c0_31, %c0_32] : memref<1x2x128xf32, #tpu.memory_space<vmem>>, vector<1x2x128xf32>
      %60 = vector.shape_cast %59 : vector<1x2x128xf32> to vector<2x128xf32>
      %61 = vector.shape_cast %58 : vector<2x128xf32> to vector<1x2x128xf32>
      tpu.vector_store %arg6[%c0_30, %c0_31, %c0_32], %61 {strides = array<i32>} : memref<1x2x128xf32, #tpu.memory_space<vmem>>, vector<1x2x128xf32>,
      %c0_33 = arith.constant 0 : index
      %c0_34 = arith.constant 0 : index
      %c0_35 = arith.constant 0 : index
      %62 = vector.load %arg7[%c0_33, %c0_34, %c0_35] : memref<1x2x128xf32, #tpu.memory_space<vmem>>, vector<1x2x128xf32>
      %63 = vector.shape_cast %62 : vector<1x2x128xf32> to vector<2x128xf32>
      %64 = arith.addf %63, %41 : vector<2x128xf32>
      %c0_36 = arith.constant 0 : index
      %c0_37 = arith.constant 0 : index
      %c0_38 = arith.constant 0 : index
      %65 = vector.load %arg7[%c0_36, %c0_37, %c0_38] : memref<1x2x128xf32, #tpu.memory_space<vmem>>, vector<1x2x128xf32>
      %66 = vector.shape_cast %65 : vector<1x2x128xf32> to vector<2x128xf32>
      %67 = vector.shape_cast %64 : vector<2x128xf32> to vector<1x2x128xf32>
      tpu.vector_store %arg7[%c0_36, %c0_37, %c0_38], %67 {strides = array<i32>} : memref<1x2x128xf32, #tpu.memory_space<vmem>>, vector<1x2x128xf32>,
      %c0_39 = arith.constant 0 : index
      %c0_40 = arith.constant 0 : index
      %c0_41 = arith.constant 0 : index
      %68 = vector.load %arg8[%c0_39, %c0_40, %c0_41] : memref<1x2x128xf32, #tpu.memory_space<vmem>>, vector<1x2x128xf32>
      %69 = vector.shape_cast %68 : vector<1x2x128xf32> to vector<2x128xf32>
      %70 = arith.addf %69, %43 : vector<2x128xf32>
      %c0_42 = arith.constant 0 : index
      %c0_43 = arith.constant 0 : index
      %c0_44 = arith.constant 0 : index
      %71 = vector.load %arg8[%c0_42, %c0_43, %c0_44] : memref<1x2x128xf32, #tpu.memory_space<vmem>>, vector<1x2x128xf32>
      %72 = vector.shape_cast %71 : vector<1x2x128xf32> to vector<2x128xf32>
      %73 = vector.shape_cast %70 : vector<2x128xf32> to vector<1x2x128xf32>
      tpu.vector_store %arg8[%c0_42, %c0_43, %c0_44], %73 {strides = array<i32>} : memref<1x2x128xf32, #tpu.memory_space<vmem>>, vector<1x2x128xf32>,
    } else {
    }
    return
  }
  func.func @transform_0(%arg0: i32, %arg1: i32) -> (i32, i32) {
    %c1_i32 = arith.constant 1 : i32
    %0 = arith.muli %arg0, %c1_i32 : i32
    %1 = arith.addi %0, %arg1 : i32
    %c0_i32 = arith.constant 0 : i32
    %c0_i32_0 = arith.constant 0 : i32
    return %c0_i32, %1 : i32, i32
  }
  func.func @transform_1(%arg0: i32, %arg1: i32) -> (i32, i32) {
    %c1_i32 = arith.constant 1 : i32
    %0 = arith.muli %arg0, %c1_i32 : i32
    %1 = arith.addi %0, %arg1 : i32
    %c0_i32 = arith.constant 0 : i32
    %c0_i32_0 = arith.constant 0 : i32
    return %c0_i32, %1 : i32, i32
  }
  func.func @transform_2(%arg0: i32, %arg1: i32) -> (i32, i32, i32) {
    %c0_i32 = arith.constant 0 : i32
    %c0_i32_0 = arith.constant 0 : i32
    %c0_i32_1 = arith.constant 0 : i32
    return %arg0, %c0_i32, %c0_i32_0 : i32, i32, i32
  }
  func.func @transform_3(%arg0: i32, %arg1: i32) -> (i32, i32, i32) {
    %c0_i32 = arith.constant 0 : i32
    %c0_i32_0 = arith.constant 0 : i32
    %c0_i32_1 = arith.constant 0 : i32
    return %arg0, %c0_i32, %c0_i32_0 : i32, i32, i32
  }
  func.func @transform_4(%arg0: i32, %arg1: i32) -> (i32, i32, i32) {
    %c0_i32 = arith.constant 0 : i32
    %c0_i32_0 = arith.constant 0 : i32
    %c0_i32_1 = arith.constant 0 : i32
    return %arg0, %c0_i32, %c0_i32_0 : i32, i32, i32
  }
  func.func @transform_5(%arg0: i32, %arg1: i32) -> (i32, i32, i32) {
    %c0_i32 = arith.constant 0 : i32
    %c0_i32_0 = arith.constant 0 : i32
    %c0_i32_1 = arith.constant 0 : i32
    return %arg0, %c0_i32, %c0_i32_0 : i32, i32, i32
  }
  func.func @transform_6(%arg0: i32, %arg1: i32) -> (i32, i32, i32) {
    %c0_i32 = arith.constant 0 : i32
    %c0_i32_0 = arith.constant 0 : i32
    %c0_i32_1 = arith.constant 0 : i32
    return %arg0, %c0_i32, %c0_i32_0 : i32, i32, i32
  }
}

</mosaic_0001>

<bundles_post_ra>
// kernel: tpu_custom_call.1
= control target key start
LH: loop header
LB: loop body
LE: loop exit
PB: predicated region body
PF: predicated region fallthrough
CT: control target
= control target key end

     0   :  { %12 = vsyncpa [#allocation3], 0  ;;  %s510_s0 = inlined_call_operand.hbm [shape: f32[2,131], index: 0, kind: input, shape index: {}]   ;;  %s511_s1 = inlined_call_operand.hbm [shape: f32[2,131], index: 1, kind: input, shape index: {}]   ;;  %s512_s2 = inlined_call_operand.hbm [shape: f32[1,2,128], index: 2, kind: output, shape index: {0}]   ;;  %s513_s3 = inlined_call_operand.hbm [shape: f32[1,2,128], index: 3, kind: output, shape index: {1}]   ;;  %s514_s4 = inlined_call_operand.hbm [shape: f32[1,2,128], index: 4, kind: output, shape index: {2}]   ;;  %s515_s5 = inlined_call_operand.hbm [shape: f32[1,2,128], index: 5, kind: output, shape index: {3}]   ;;  %s516_s6 = inlined_call_operand.hbm [shape: f32[1,2,128], index: 6, kind: output, shape index: {4}]  }
   0x1   :  { %13 = vsyncpa [#allocation6], 0 }
   0x2   :  { %14 = vsyncpa [#allocation4], 0 }
   0x3   :  { %15 = vsyncpa [#allocation9], 0 }
   0x4   :  { %16 = vsyncpa [#allocation12], 0  ;;  %s355_s21 = smov [#allocation2]   ;;  %s356_s23 = smov [#allocation5]  }
   0x5   :  { %s27_s22 = sshll.u32 %s355_s21, 4  ;;  %s41_s24 = sshll.u32 %s356_s23, 4  ;;  %s28_s22 = int_to_ptr.vmem [resolvable:$true] %s27_s22  ;;  %s42_s24 = int_to_ptr.vmem [resolvable:$true] %s41_s24 }
   0x6   :  { %s191_s27 = scalar_lea.hbm %s510_s0, 64 }
   0x7   :  { %p192_p0 = scmp.ne.s32.totalorder %s510_s0, %s191_s27  ;;  %p195_p1 = scmp.lt.u32.totalorder %s191_s27, %s510_s0 }
   0x9   :  { %p197_p2 = pnand %p195_p1, %p192_p0 }
   0xb   :  { %200 = shalt.err (!%p197_p2)
}
   0xc   :  { %s201_s8 = scalar_lea.vmem %s28_s22, 64  ;;  %p206_p4 = scmp.lt.s32.totalorder %s28_s22, %s28_s22 }
   0xd   :  { %p202_p3 = scmp.ne.s32.totalorder %s28_s22, %s201_s8  ;;  %p207_p5 = scmp.lt.s32.totalorder %s201_s8, %s201_s8 }
   0xf   :  { %p208_p6 = por %p207_p5, %p206_p4 }
  0x11   :  { %p209_p7 = pnand %p208_p6, %p202_p3 }
  0x13   :  { %212 = shalt.err (!%p209_p7)
}
  0x14   :  { %30 = dma.hbm_to_vmem [thread:$0]  %s510_s0, 64, %s28_s22, [#allocation3]  }
  0x15   :  { %s213_s13 = scalar_lea.hbm %s511_s1, 64 }
  0x16   :  { %p214_p8 = scmp.ne.s32.totalorder %s511_s1, %s213_s13  ;;  %p217_p9 = scmp.lt.u32.totalorder %s213_s13, %s511_s1 }
  0x18   :  { %p219_p10 = pnand %p217_p9, %p214_p8 }
  0x1a   :  { %222 = shalt.err (!%p219_p10)
}
  0x1b   :  { %s223_s18 = scalar_lea.vmem %s42_s24, 64  ;;  %p228_p12 = scmp.lt.s32.totalorder %s42_s24, %s42_s24 }
  0x1c   :  { %p224_p11 = scmp.ne.s32.totalorder %s42_s24, %s223_s18  ;;  %p229_p13 = scmp.lt.s32.totalorder %s223_s18, %s223_s18 }
  0x1e   :  { %p230_p0 = por %p229_p13, %p228_p12 }
  0x20   :  { %p231_p1 = pnand %p230_p0, %p224_p11 }
  0x22   :  { %234 = shalt.err (!%p231_p1)
}
  0x23   :  { %44 = dma.hbm_to_vmem [thread:$0]  %s511_s1, 64, %s42_s24, [#allocation6]  }
  0x24   :  { %345 = dma.done.wait [#allocation3], 64  }
  0x25   :  { %346 = vsyncadd [#allocation3], 4294967232 }
  0x26   :  { %347 = dma.done.wait [#allocation6], 64  }
  0x27   :  { %348 = vsyncadd [#allocation6], 4294967232  ;;  %vm73_vm0 = vcmask 1041432   ;;  %v357_v0 = vmov 0.0   ;;  %s358_s20 = smov [#allocation8]   ;;  %s359_s1 = smov [#allocation11]  }
  0x28   :  { %74 = vst.msk [vmem:[#allocation2 + $0x2] sm:$0x3] %vm73_vm0, %v357_v0  ;;  %60 = vst [vmem:[#allocation7] sm:$0x3] %v357_v0  ;;  %s129_s21 = sshll.u32 %s358_s20, 4  ;;  %s149_s22 = sshll.u32 %s359_s1, 4  ;;  %s130_s21 = int_to_ptr.vmem [resolvable:$true] %s129_s21  ;;  %s422_s22 = int_to_ptr.vmem [resolvable:$true] %s149_s22 }
  0x29   :  { %61 = vst [vmem:[#allocation8] sm:$0x3] %v357_v0  ;;  %62 = vst [vmem:[#allocation10] sm:$0x3] %v357_v0  ;;  %v77_v1 = vld [vmem:[#allocation5] sm:$0x3]  ;;  %p240_p3 = scmp.lt.s32.totalorder %s130_s21, %s130_s21 }
  0x2a   :  { %63 = vst [vmem:[#allocation11] sm:$0x3] %v357_v0  ;;  %64 = vst [vmem:[#allocation13] sm:$0x3] %v357_v0  ;;  %v76_v2 = vld [vmem:[#allocation2] sm:$0x3]  ;;  %v82_v7 = vmul.f32 %v77_v1, %v77_v1 }
  0x2b   :  { %75 = vst.msk [vmem:[#allocation5 + $0x2] sm:$0x3] %vm73_vm0, %v357_v0  ;;  %v80_v6 = vmul.f32 %v77_v1, %v76_v2  ;;  %v84_v8 = vmul.f32 %v76_v2, %v76_v2  ;;  %s360_s23 = smov [#allocation7]   ;;  %s361_s25 = smov [#allocation10]  }
  0x2c   :  { %s119_s24 = sshll.u32 %s360_s23, 4  ;;  %s139_s26 = sshll.u32 %s361_s25, 4  ;;  %s424_s24 = int_to_ptr.vmem [resolvable:$true] %s119_s24  ;;  %s426_s26 = int_to_ptr.vmem [resolvable:$true] %s139_s26 }
  0x2d   :  { %s362_s27 = smov [#allocation13]   ;;  %s235_s29 = scalar_lea.vmem %s130_s21, 32 }
  0x2e   :  { %s159_s28 = sshll.u32 %s362_s27, 4  ;;  %p236_p2 = scmp.ne.s32.totalorder %s130_s21, %s235_s29  ;;  %s428_s28 = int_to_ptr.vmem [resolvable:$true] %s159_s28 }
  0x2f   :  { %v87_v5 = vld [vmem:[#allocation2 + $0x2] sm:$0x3]  ;;  %v98_v11 = vld [vmem:[#allocation7] sm:$0x3]  ;;  %p241_p4 = scmp.lt.s32.totalorder %s235_s29, %s235_s29 }
  0x30   :  { %v101_v4 = vld [vmem:[#allocation8] sm:$0x3]  ;;  %v90_v10 = vadd.f32 %v87_v5, %v76_v2  ;;  %v104_v14 = vld [vmem:[#allocation10] sm:$0x3]  ;;  %v96_v16 = vmul.f32 %v87_v5, %v87_v5 }
  0x31   :  { %v107_v15 = vld [vmem:[#allocation11] sm:$0x3]  ;;  %v110_v21 = vld [vmem:[#allocation13] sm:$0x3]  ;;  %p242_p5 = por %p241_p4, %p240_p3 }
  0x32   :  { %v89_v3 = vld [vmem:[#allocation5 + $0x2] sm:$0x3]  ;;  %v99_v18 = vadd.f32 %v98_v11, %v90_v10  ;;  %v97_v22 = vadd.f32 %v96_v16, %v84_v8 }
  0x33   :  { %v91_v9 = vadd.f32 %v89_v3, %v77_v1  ;;  %v92_v12 = vmul.f32 %v89_v3, %v87_v5  ;;  %v94_v13 = vmul.f32 %v89_v3, %v89_v3  ;;  %p243_p6 = pnand %p242_p5, %p236_p2 }
  0x34   :  { %100 = vst [vmem:[#allocation7] sm:$0x3] %v99_v18  ;;  %v111_v25 = vadd.f32 %v110_v21, %v97_v22 }
  0x35   :  { %v102_v17 = vadd.f32 %v101_v4, %v91_v9  ;;  %v93_v19 = vadd.f32 %v92_v12, %v80_v6  ;;  %v95_v20 = vadd.f32 %v94_v13, %v82_v7 }
  0x37   :  { %103 = vst [vmem:[#allocation8] sm:$0x3] %v102_v17  ;;  %v105_v23 = vadd.f32 %v104_v14, %v93_v19  ;;  %v108_v24 = vadd.f32 %v107_v15, %v95_v20 }
  0x38   :  { %246 = shalt.err (!%p243_p6)
}
  0x39   :  { %s247_s8 = scalar_lea.hbm %s513_s3, 32 }
  0x3a   :  { %p248_p7 = scmp.ne.s32.totalorder %s513_s3, %s247_s8  ;;  %p251_p8 = scmp.lt.u32.totalorder %s247_s8, %s513_s3 }
  0x3c   :  { %p253_p9 = pnand %p251_p8, %p248_p7 }
  0x3e   :  { %256 = shalt.err (!%p253_p9)
}
  0x3f   :  { %132 = dma.vmem_to_hbm [thread:$0]  %s130_s21, 32, %s513_s3, [#allocation9]   ;;  %106 = vst [vmem:[#allocation10] sm:$0x3] %v105_v23  ;;  %109 = vst [vmem:[#allocation11] sm:$0x3] %v108_v24 }
  0x40   :  { %s257_s15 = scalar_lea.vmem %s424_s24, 32  ;;  %p262_p11 = scmp.lt.s32.totalorder %s424_s24, %s424_s24 }
  0x41   :  { %p258_p10 = scmp.ne.s32.totalorder %s424_s24, %s257_s15  ;;  %p263_p12 = scmp.lt.s32.totalorder %s257_s15, %s257_s15 }
  0x43   :  { %p264_p13 = por %p263_p12, %p262_p11 }
  0x45   :  { %p265_p0 = pnand %p264_p13, %p258_p10 }
  0x47   :  { %268 = shalt.err (!%p265_p0)
}
  0x48   :  { %s269_s18 = scalar_lea.hbm %s512_s2, 32 }
  0x49   :  { %p270_p1 = scmp.ne.s32.totalorder %s512_s2, %s269_s18  ;;  %p273_p2 = scmp.lt.u32.totalorder %s269_s18, %s512_s2 }
  0x4b   :  { %p275_p3 = pnand %p273_p2, %p270_p1 }
  0x4d   :  { %278 = shalt.err (!%p275_p3)
}
  0x4e   :  { %122 = dma.vmem_to_hbm [thread:$0]  %s424_s24, 32, %s512_s2, [#allocation4]   ;;  %112 = vst [vmem:[#allocation13] sm:$0x3] %v111_v25 }
  0x4f   :  { %s279_s23 = scalar_lea.vmem %s422_s22, 32  ;;  %p284_p5 = scmp.lt.s32.totalorder %s422_s22, %s422_s22 }
  0x50   :  { %p280_p4 = scmp.ne.s32.totalorder %s422_s22, %s279_s23  ;;  %p285_p6 = scmp.lt.s32.totalorder %s279_s23, %s279_s23 }
  0x52   :  { %p286_p7 = por %p285_p6, %p284_p5 }
  0x54   :  { %p287_p8 = pnand %p286_p7, %p280_p4 }
  0x56   :  { %290 = shalt.err (!%p287_p8)
}
  0x57   :  { %s291_s29 = scalar_lea.hbm %s515_s5, 32 }
  0x58   :  { %p292_p9 = scmp.ne.s32.totalorder %s515_s5, %s291_s29  ;;  %p295_p10 = scmp.lt.u32.totalorder %s291_s29, %s515_s5 }
  0x5a   :  { %p297_p11 = pnand %p295_p10, %p292_p9 }
  0x5c   :  { %300 = shalt.err (!%p297_p11)
}
  0x5d   :  { %152 = dma.vmem_to_hbm [thread:$0]  %s422_s22, 32, %s515_s5, [#allocation12]  }
  0x5e   :  { %s301_s10 = scalar_lea.vmem %s426_s26, 32  ;;  %p306_p13 = scmp.lt.s32.totalorder %s426_s26, %s426_s26 }
  0x5f   :  { %p302_p12 = scmp.ne.s32.totalorder %s426_s26, %s301_s10  ;;  %p307_p0 = scmp.lt.s32.totalorder %s301_s10, %s301_s10 }
  0x61   :  { %p308_p1 = por %p307_p0, %p306_p13 }
  0x63   :  { %p309_p2 = pnand %p308_p1, %p302_p12 }
  0x65   :  { %312 = shalt.err (!%p309_p2)
}
  0x66   :  { %s313_s13 = scalar_lea.hbm %s514_s4, 32 }
  0x67   :  { %p314_p3 = scmp.ne.s32.totalorder %s514_s4, %s313_s13  ;;  %p317_p4 = scmp.lt.u32.totalorder %s313_s13, %s514_s4 }
  0x69   :  { %p319_p5 = pnand %p317_p4, %p314_p3 }
  0x6b   :  { %322 = shalt.err (!%p319_p5)
}
  0x6c   :  { %142 = dma.vmem_to_hbm [thread:$0]  %s426_s26, 32, %s514_s4, [#allocation9]  }
  0x6d   :  { %s323_s18 = scalar_lea.vmem %s428_s28, 32  ;;  %p328_p7 = scmp.lt.s32.totalorder %s428_s28, %s428_s28 }
  0x6e   :  { %p324_p6 = scmp.ne.s32.totalorder %s428_s28, %s323_s18  ;;  %p329_p8 = scmp.lt.s32.totalorder %s323_s18, %s323_s18 }
  0x70   :  { %p330_p9 = por %p329_p8, %p328_p7 }
  0x72   :  { %p331_p10 = pnand %p330_p9, %p324_p6 }
  0x74   :  { %334 = shalt.err (!%p331_p10)
}
  0x75   :  { %s335_s20 = scalar_lea.hbm %s516_s6, 32 }
  0x76   :  { %p336_p11 = scmp.ne.s32.totalorder %s516_s6, %s335_s20  ;;  %p339_p12 = scmp.lt.u32.totalorder %s335_s20, %s516_s6 }
  0x78   :  { %p341_p13 = pnand %p339_p12, %p336_p11 }
  0x7a   :  { %344 = shalt.err (!%p341_p13)
}
  0x7b   :  { %162 = dma.vmem_to_hbm [thread:$0]  %s428_s28, 32, %s516_s6, [#allocation12]  }
  0x7c   :  { %349 = dma.done.wait [#allocation4], 32  }
  0x7d   :  { %350 = vsyncadd [#allocation4], 4294967264 }
  0x7e   :  { %351 = dma.done.wait [#allocation9], 64  }
  0x7f   :  { %352 = vsyncadd [#allocation9], 4294967232 }
  0x80   :  { %353 = dma.done.wait [#allocation12], 64  }
  0x81   :  { %354 = vsyncadd [#allocation12], 4294967232 }
  0x82   :  { %178 = vsyncpa [#allocation3], 1 }
  0x83   :  { %179 = vsyncpa [#allocation6], 1 }
  0x84   :  { %180 = vsyncpa [#allocation4], 1 }
  0x85   :  { %181 = vsyncpa [#allocation9], 1 }
  0x86   :  { %182 = vsyncpa [#allocation12], 1 }

</bundles_post_ra>
